<compile_context>
chip_gen: v7x
topology: tpu7x:2x2x1
jax: 0.10.0
libtpu: 0.0.40
codegen_flags: <defaults>
</compile_context>

<pallas_src>
import math

import jax
import jax.numpy as jnp
from jax.experimental import pallas as pl
from jax.experimental.pallas import tpu as pltpu

# --- Cody-Waite split of 2*pi: r = (x - k*HI) - k*LO, k*HI exact for |k| < 2^15.
_INV_2PI = 0.15915494309189535
_2PI_HI = 6.28125                      # exact in 9 mantissa bits
_2PI_LO = 0.0019353071795864769        # 2*pi - _2PI_HI

# sin(r) = r + r*r2*P(r2), cos(r) = 1 + r2*Q(r2) on r in [-pi, pi].
_SIN_COEFFS = (                        # c15 .. c3 (Horner in r2)
    -1.0 / 1307674368000.0,
     1.0 / 6227020800.0,
    -1.0 / 39916800.0,
     1.0 / 362880.0,
    -1.0 / 5040.0,
     1.0 / 120.0,
    -1.0 / 6.0,
)
_COS_COEFFS = (                        # c16 .. c2 (Horner in r2)
     1.0 / 20922789888000.0,
    -1.0 / 87178291200.0,
     1.0 / 479001600.0,
    -1.0 / 3628800.0,
     1.0 / 40320.0,
    -1.0 / 720.0,
     1.0 / 24.0,
    -0.5,
)


def _tpe_kernel(t_ref, const_ref, o_ref):
    div_term = const_ref[0:1, :]                     # (1, E) frequencies
    parity = const_ref[1:2, :]                       # (1, E) 0.0=sin col, 1.0=cos col

    x = t_ref[...] * div_term                        # (TILE_S, 1)*(1, E) -> (TILE_S, E)

    # Shared range reduction to [-pi, pi] (used by both the sin and cos polys).
    k = jnp.floor(x * _INV_2PI + 0.5)
    r = (x - k * _2PI_HI) - k * _2PI_LO
    r2 = r * r

    sp = jnp.float32(_SIN_COEFFS[0])
    for c in _SIN_COEFFS[1:]:
        sp = sp * r2 + jnp.float32(c)
    sin_v = r + r * (r2 * sp)

    cp = jnp.float32(_COS_COEFFS[0])
    for c in _COS_COEFFS[1:]:
        cp = cp * r2 + jnp.float32(c)
    cos_v = 1.0 + r2 * cp

    o_ref[...] = jnp.where(parity > 0.5, cos_v, sin_v).astype(o_ref.dtype)


def _pick_tile_s(seq_len: int, embedding_dim: int,
                 target_tile_bytes: int = 8 << 20, max_rows: int = 2048) -> int:
    """Row tile: ~8 MiB f32 output tile, <=2048 rows, >=2 grid steps when possible."""
    if seq_len <= 8:
        return seq_len
    rows = (target_tile_bytes // (4 * embedding_dim)) & ~7
    rows = max(8, min(rows, max_rows))
    half = max(8, (seq_len // 2) & ~7)               # leave >=2 steps for v7x's 2 TCs
    rows = min(rows, half)
    return min(rows, seq_len)


def _padded_tile_bytes(rows: int, cols: int, itemsize: int) -> int:
    return (-(-rows // 8) * 8) * (-(-cols // 128) * 128) * itemsize


def time_positional_encoding(event_times: jax.Array, embedding_dim: int,
                             out_dtype=jnp.float32) -> jax.Array:
    """event_times: (seq_len, 1) -> (seq_len, embedding_dim). Math is f32."""
    seq_len = event_times.shape[0]
    f32 = jnp.float32

    # Buffer from __init__: div_term[j] = exp(2*(j//2) * -(ln(10000)/E)).
    i = jnp.arange(0, embedding_dim, dtype=f32)
    div_term = jnp.exp(2.0 * jnp.floor(i / 2.0) * (-(math.log(10000.0) / embedding_dim)))
    parity = (jnp.arange(embedding_dim) % 2).astype(f32)     # 0 -> sin, 1 -> cos
    consts = jnp.stack([div_term, parity], axis=0)           # (2, E), single DMA stream

    tile_s = _pick_tile_s(seq_len, embedding_dim)
    grid = (pl.cdiv(seq_len, tile_s),)

    out_itemsize = jnp.dtype(out_dtype).itemsize
    vmem_budget = (2 * _padded_tile_bytes(tile_s, embedding_dim, out_itemsize)
                   + 2 * _padded_tile_bytes(tile_s, 1, 4)
                   + 2 * _padded_tile_bytes(2, embedding_dim, 4)
                   + (4 << 20))                               # headroom
    vmem_limit = int(min(max(vmem_budget, 32 << 20), 64 << 20))

    cost = pl.CostEstimate(
        flops=40 * seq_len * embedding_dim,                   # VPU poly work, no EUP
        transcendentals=0,
        bytes_accessed=4 * seq_len + 4 * 2 * embedding_dim
        + out_itemsize * seq_len * embedding_dim,
    )

    out = pl.pallas_call(
        _tpe_kernel,
        out_shape=jax.ShapeDtypeStruct((seq_len, embedding_dim), out_dtype),
        grid=grid,
        in_specs=[
            pl.BlockSpec((tile_s, 1), lambda s: (s, 0)),
            pl.BlockSpec((2, embedding_dim), lambda s: (0, 0)),   # resident constants
        ],
        out_specs=pl.BlockSpec((tile_s, embedding_dim), lambda s: (s, 0)),
        compiler_params=pltpu.CompilerParams(
            dimension_semantics=("parallel",),
            vmem_limit_bytes=vmem_limit,
        ),
        cost_estimate=cost,
    )(event_times.astype(f32), consts)
    return out


def _reference(event_times, embedding_dim):
    # Matches the PyTorch module: interleaved sin (even cols) / cos (odd cols).
    f32 = jnp.float32
    i = jnp.arange(0, embedding_dim, dtype=f32)
    div_term = jnp.exp(2.0 * jnp.floor(i / 2.0) * (-(math.log(10000.0) / embedding_dim)))
    result = event_times.astype(f32) * div_term               # (S, E)
    col = jnp.arange(embedding_dim)
    return jnp.where((col % 2) == 0, jnp.sin(result), jnp.cos(result))


if __name__ == "__main__":
    key = jax.random.PRNGKey(0)
    seq_len, embedding_dim = 8, 32
    # event_times: (seq_len, 1), non-negative "times"
    event_times = jax.random.uniform(key, (seq_len, 1), dtype=jnp.float32) * 10.0

    out = time_positional_encoding(event_times, embedding_dim)
    out = jax.block_until_ready(out)

    ref = _reference(event_times, embedding_dim)
    assert out.shape == (seq_len, embedding_dim)
    assert out.dtype == jnp.float32
    assert jnp.allclose(out, ref, atol=1e-5, rtol=1e-5)

    print("KERNEL_OK")
</pallas_src>

<mosaic_0001>
module attributes {stable_mosaic.version = 11 : i64} {
  func.func @_tpe_kernel(%arg0: i32, %arg1: memref<8x1xf32, #tpu.memory_space<vmem>>, %arg2: memref<2x32xf32, #tpu.memory_space<vmem>>, %arg3: memref<8x32xf32, #tpu.memory_space<vmem>>) attributes {dimension_semantics = [#tpu.dimension_semantics<parallel>], iteration_bounds = array<i64: 1>, scalar_prefetch = 0 : i64, scratch_operands = 0 : i64, tpu.core_type = #tpu.core_type<tc>, window_params = [{transform_indices = @transform_0, window_bounds = array<i64: 8, 1>}, {pipeline_mode = #tpu.pipeline_mode<synchronous>, transform_indices = @transform_1, window_bounds = array<i64: 2, 32>}, {transform_indices = @transform_2, window_bounds = array<i64: 8, 32>}]} {
    %c0 = arith.constant 0 : index
    %c0_0 = arith.constant 0 : index
    %0 = vector.load %arg2[%c0, %c0_0] : memref<2x32xf32, #tpu.memory_space<vmem>>, vector<1x32xf32>
    %c1 = arith.constant 1 : index
    %c0_1 = arith.constant 0 : index
    %1 = vector.load %arg2[%c1, %c0_1] : memref<2x32xf32, #tpu.memory_space<vmem>>, vector<1x32xf32>
    %c0_2 = arith.constant 0 : index
    %c0_3 = arith.constant 0 : index
    %2 = vector.load %arg1[%c0_2, %c0_3] : memref<8x1xf32, #tpu.memory_space<vmem>>, vector<8x1xf32>
    %3 = vector.broadcast %2 : vector<8x1xf32> to vector<8x32xf32>
    %4 = vector.broadcast %0 : vector<1x32xf32> to vector<8x32xf32>
    %5 = arith.mulf %3, %4 : vector<8x32xf32>
    %cst = arith.constant 0.159154937 : f32
    %6 = vector.broadcast %cst : f32 to vector<8x32xf32>
    %7 = arith.mulf %5, %6 : vector<8x32xf32>
    %cst_4 = arith.constant 5.000000e-01 : f32
    %8 = vector.broadcast %cst_4 : f32 to vector<8x32xf32>
    %9 = arith.addf %7, %8 : vector<8x32xf32>
    %10 = math.floor %9 : vector<8x32xf32>
    %cst_5 = arith.constant 6.281250e+00 : f32
    %11 = vector.broadcast %cst_5 : f32 to vector<8x32xf32>
    %12 = arith.mulf %10, %11 : vector<8x32xf32>
    %13 = arith.subf %5, %12 : vector<8x32xf32>
    %cst_6 = arith.constant 0.00193530717 : f32
    %14 = vector.broadcast %cst_6 : f32 to vector<8x32xf32>
    %15 = arith.mulf %10, %14 : vector<8x32xf32>
    %16 = arith.subf %13, %15 : vector<8x32xf32>
    %17 = arith.mulf %16, %16 : vector<8x32xf32>
    %cst_7 = arith.constant -7.6471636E-13 : f32
    %18 = vector.broadcast %cst_7 : f32 to vector<8x32xf32>
    %19 = arith.mulf %18, %17 : vector<8x32xf32>
    %cst_8 = arith.constant 1.60590444E-10 : f32
    %20 = vector.broadcast %cst_8 : f32 to vector<8x32xf32>
    %21 = arith.addf %19, %20 : vector<8x32xf32>
    %22 = arith.mulf %21, %17 : vector<8x32xf32>
    %cst_9 = arith.constant -2.50521079E-8 : f32
    %23 = vector.broadcast %cst_9 : f32 to vector<8x32xf32>
    %24 = arith.addf %22, %23 : vector<8x32xf32>
    %25 = arith.mulf %24, %17 : vector<8x32xf32>
    %cst_10 = arith.constant 2.75573188E-6 : f32
    %26 = vector.broadcast %cst_10 : f32 to vector<8x32xf32>
    %27 = arith.addf %25, %26 : vector<8x32xf32>
    %28 = arith.mulf %27, %17 : vector<8x32xf32>
    %cst_11 = arith.constant -1.98412701E-4 : f32
    %29 = vector.broadcast %cst_11 : f32 to vector<8x32xf32>
    %30 = arith.addf %28, %29 : vector<8x32xf32>
    %31 = arith.mulf %30, %17 : vector<8x32xf32>
    %cst_12 = arith.constant 0.00833333377 : f32
    %32 = vector.broadcast %cst_12 : f32 to vector<8x32xf32>
    %33 = arith.addf %31, %32 : vector<8x32xf32>
    %34 = arith.mulf %33, %17 : vector<8x32xf32>
    %cst_13 = arith.constant -0.166666672 : f32
    %35 = vector.broadcast %cst_13 : f32 to vector<8x32xf32>
    %36 = arith.addf %34, %35 : vector<8x32xf32>
    %37 = arith.mulf %17, %36 : vector<8x32xf32>
    %38 = arith.mulf %16, %37 : vector<8x32xf32>
    %39 = arith.addf %16, %38 : vector<8x32xf32>
    %cst_14 = arith.constant 4.77947726E-14 : f32
    %40 = vector.broadcast %cst_14 : f32 to vector<8x32xf32>
    %41 = arith.mulf %40, %17 : vector<8x32xf32>
    %cst_15 = arith.constant -1.14707454E-11 : f32
    %42 = vector.broadcast %cst_15 : f32 to vector<8x32xf32>
    %43 = arith.addf %41, %42 : vector<8x32xf32>
    %44 = arith.mulf %43, %17 : vector<8x32xf32>
    %cst_16 = arith.constant 2.08767559E-9 : f32
    %45 = vector.broadcast %cst_16 : f32 to vector<8x32xf32>
    %46 = arith.addf %44, %45 : vector<8x32xf32>
    %47 = arith.mulf %46, %17 : vector<8x32xf32>
    %cst_17 = arith.constant -2.755732E-7 : f32
    %48 = vector.broadcast %cst_17 : f32 to vector<8x32xf32>
    %49 = arith.addf %47, %48 : vector<8x32xf32>
    %50 = arith.mulf %49, %17 : vector<8x32xf32>
    %cst_18 = arith.constant 2.48015876E-5 : f32
    %51 = vector.broadcast %cst_18 : f32 to vector<8x32xf32>
    %52 = arith.addf %50, %51 : vector<8x32xf32>
    %53 = arith.mulf %52, %17 : vector<8x32xf32>
    %cst_19 = arith.constant -0.00138888892 : f32
    %54 = vector.broadcast %cst_19 : f32 to vector<8x32xf32>
    %55 = arith.addf %53, %54 : vector<8x32xf32>
    %56 = arith.mulf %55, %17 : vector<8x32xf32>
    %cst_20 = arith.constant 0.0416666679 : f32
    %57 = vector.broadcast %cst_20 : f32 to vector<8x32xf32>
    %58 = arith.addf %56, %57 : vector<8x32xf32>
    %59 = arith.mulf %58, %17 : vector<8x32xf32>
    %cst_21 = arith.constant -5.000000e-01 : f32
    %60 = vector.broadcast %cst_21 : f32 to vector<8x32xf32>
    %61 = arith.addf %59, %60 : vector<8x32xf32>
    %62 = arith.mulf %17, %61 : vector<8x32xf32>
    %cst_22 = arith.constant 1.000000e+00 : f32
    %63 = vector.broadcast %cst_22 : f32 to vector<8x32xf32>
    %64 = arith.addf %63, %62 : vector<8x32xf32>
    %cst_23 = arith.constant 5.000000e-01 : f32
    %65 = vector.broadcast %cst_23 : f32 to vector<1x32xf32>
    %66 = arith.cmpf ogt, %1, %65 : vector<1x32xf32>
    %67 = vector.shape_cast %66 : vector<1x32xi1> to vector<1x32xi1>
    %68 = vector.broadcast %67 : vector<1x32xi1> to vector<8x32xi1>
    %69 = arith.select %68, %64, %39 : vector<8x32xi1>, vector<8x32xf32>
    %c0_24 = arith.constant 0 : index
    %c0_25 = arith.constant 0 : index
    %70 = vector.load %arg3[%c0_24, %c0_25] : memref<8x32xf32, #tpu.memory_space<vmem>>, vector<8x32xf32>
    tpu.vector_store %arg3[%c0_24, %c0_25], %69 {strides = array<i32>} : memref<8x32xf32, #tpu.memory_space<vmem>>, vector<8x32xf32>,
    return
  }
  func.func @transform_0(%arg0: i32) -> (i32, i32) {
    %c0_i32 = arith.constant 0 : i32
    %c0_i32_0 = arith.constant 0 : i32
    return %arg0, %c0_i32 : i32, i32
  }
  func.func @transform_1(%arg0: i32) -> (i32, i32) {
    %c0_i32 = arith.constant 0 : i32
    %c0_i32_0 = arith.constant 0 : i32
    %c0_i32_1 = arith.constant 0 : i32
    return %c0_i32, %c0_i32_0 : i32, i32
  }
  func.func @transform_2(%arg0: i32) -> (i32, i32) {
    %c0_i32 = arith.constant 0 : i32
    %c0_i32_0 = arith.constant 0 : i32
    return %arg0, %c0_i32 : i32, i32
  }
}

</mosaic_0001>

<bundles_post_ra>
// kernel: tpu_custom_call.1
= control target key start
LH: loop header
LB: loop body
LE: loop exit
PB: predicated region body
PF: predicated region fallthrough
CT: control target
= control target key end

     0   :  { %s154_s0 = inlined_call_operand.vmem [shape: f32[8,1], index: 0, kind: input, shape index: {}]   ;;  %s155_s1 = inlined_call_operand.vmem [shape: f32[2,32], index: 1, kind: input, shape index: {}]   ;;  %s156_s2 = inlined_call_operand.hbm [shape: f32[8,32], index: 2, kind: output, shape index: {}]  }
   0x1   :  { %v14_v0 = vld [vmem:[%s154_s0] sm:$0xff] }
   0x2   :  { %7 = vsyncpa [#allocation3], 0  ;;  %v116_v1 = vmov 0   ;;  %v88_v2 = vld [vmem:[%s155_s1] ss:$0 sm:$0xff]  ;;  %v66_v27 = vlaneseq  ;;  %s117_s14 = smov [#allocation2]  }
   0x3   :  { %91 = vset.pattern.permute.xlu0 %v116_v1  ;;  %v13_v30 = vld [vmem:[%s155_s1 + $0x1] sm:$0x1]  ;;  %s80_s1 = sshll.u32 %s117_s14, 4  ;;  %vm72_vm2 = vcmask 261120   ;;  %s81_s1 = int_to_ptr.vmem [resolvable:$true] %s80_s1 }
   0x4   :  { %17 = vperm.xlu0 %91, %v14_v0   ;;  %v67_v33 = vshrl.u32 %v66_v27, 7  ;;  %vm64_vm0 = vcmp.gt.f32.partialorder %v13_v30, 0.5  ;;  %s92_s15 = scalar_lea.vmem %s81_s1, 128  ;;  %p97_p1 = scmp.lt.s32.totalorder %s81_s1, %s81_s1 }
   0x5   :  { %v65_v39 = vsel %vm64_vm0, 1, %v116_v1  ;;  %p93_p0 = scmp.ne.s32.totalorder %s81_s1, %s92_s15  ;;  %p98_p2 = scmp.lt.s32.totalorder %s92_s15, %s92_s15 }
   0x6   :  { %v68_v38 = vsub.s32 0, %v67_v33 }
   0x7   :  { %p99_p3 = por %p98_p2, %p97_p1 }
   0x8   :  { %v69_v44 = vrot.slane %v65_v39, %v68_v38 }
   0x9   :  { %p100_p4 = pnand %p99_p3, %p93_p0 }
   0xa   :  { %vm70_vm1 = vcmp.eq.s32.totalorder %v69_v44, 1 }
  0x83   :  { %v18_v3 = vpop.permute.xlu0 %17 }
  0x84   :  { %v24_v4 = vmul.f32 %v88_v2, %v18_v3 }
  0x86   :  { %v25_v5 = vmul.f32 0.15915494, %v24_v4 }
  0x88   :  { %v26_v6 = vadd.f32 0.5, %v25_v5 }
  0x8a   :  { %v27_v7 = vfloor.f32 %v26_v6 }
  0x8c   :  { %v28_v8 = vmul.f32 6.28125, %v27_v7  ;;  %v30_v10 = vmul.f32 0.0019353072, %v27_v7 }
  0x8e   :  { %v29_v9 = vsub.f32 %v24_v4, %v28_v8 }
  0x90   :  { %v31_v11 = vsub.f32 %v29_v9, %v30_v10 }
  0x92   :  { %v32_v12 = vmul.f32 %v31_v11, %v31_v11 }
  0x94   :  { %v33_v13 = vmul.f32 -7.6471636e-13, %v32_v12  ;;  %v48_v14 = vmul.f32 4.7794773e-14, %v32_v12 }
  0x96   :  { %v34_v15 = vadd.f32 1.6059044e-10, %v33_v13  ;;  %v49_v16 = vadd.f32 -1.1470745e-11, %v48_v14 }
  0x98   :  { %v35_v17 = vmul.f32 %v34_v15, %v32_v12  ;;  %v50_v18 = vmul.f32 %v49_v16, %v32_v12 }
  0x9a   :  { %v36_v19 = vadd.f32 -2.5052108e-08, %v35_v17  ;;  %v51_v20 = vadd.f32 2.0876756e-09, %v50_v18 }
  0x9c   :  { %v37_v21 = vmul.f32 %v36_v19, %v32_v12  ;;  %v52_v22 = vmul.f32 %v51_v20, %v32_v12 }
  0x9e   :  { %v38_v23 = vadd.f32 2.7557319e-06, %v37_v21  ;;  %v53_v24 = vadd.f32 -2.755732e-07, %v52_v22 }
  0xa0   :  { %v39_v25 = vmul.f32 %v38_v23, %v32_v12  ;;  %v54_v26 = vmul.f32 %v53_v24, %v32_v12 }
  0xa2   :  { %v40_v28 = vadd.f32 -0.0001984127, %v39_v25  ;;  %v55_v29 = vadd.f32 2.4801588e-05, %v54_v26 }
  0xa4   :  { %v41_v31 = vmul.f32 %v40_v28, %v32_v12  ;;  %v56_v32 = vmul.f32 %v55_v29, %v32_v12 }
  0xa6   :  { %v42_v34 = vadd.f32 0.008333334, %v41_v31  ;;  %v57_v35 = vadd.f32 -0.0013888889, %v56_v32 }
  0xa8   :  { %v43_v36 = vmul.f32 %v42_v34, %v32_v12  ;;  %v58_v37 = vmul.f32 %v57_v35, %v32_v12 }
  0xaa   :  { %v44_v40 = vadd.f32 -0.16666667, %v43_v36  ;;  %v59_v41 = vadd.f32 0.041666668, %v58_v37 }
  0xac   :  { %v45_v42 = vmul.f32 %v44_v40, %v32_v12  ;;  %v60_v43 = vmul.f32 %v59_v41, %v32_v12 }
  0xae   :  { %v46_v45 = vmul.f32 %v45_v42, %v31_v11  ;;  %v61_v46 = vadd.f32 -0.5, %v60_v43 }
  0xb0   :  { %v62_v47 = vmul.f32 %v61_v46, %v32_v12  ;;  %v47_v48 = vadd.f32 %v46_v45, %v31_v11 }
  0xb2   :  { %v63_v49 = vadd.f32 1.0, %v62_v47 }
  0xb4   :  { %v71_v50 = vsel %vm70_vm1, %v63_v49, %v47_v48 }
  0xb5   :  { %73 = vst.msk [vmem:[#allocation2] sm:$0xff] %vm72_vm2, %v71_v50 }
  0xb6   :  { %103 = shalt.err (!%p100_p4)
}
  0xb7   :  { %s104_s18 = scalar_lea.hbm %s156_s2, 128 }
  0xb8   :  { %p105_p5 = scmp.ne.s32.totalorder %s156_s2, %s104_s18  ;;  %p108_p6 = scmp.lt.u32.totalorder %s104_s18, %s156_s2 }
  0xba   :  { %p110_p7 = pnand %p108_p6, %p105_p5 }
  0xbc   :  { %113 = shalt.err (!%p110_p7)
}
  0xbd   :  { %83 = dma.vmem_to_hbm [thread:$0]  %s81_s1, 128, %s156_s2, [#allocation3]  }
  0xbe   :  { %114 = dma.done.wait [#allocation3], 128  }
  0xbf   :  { %115 = vsyncadd [#allocation3], 4294967168 }
  0xc0   :  { %87 = vsyncpa [#allocation3], 1 }

</bundles_post_ra>
